<compile_context>
chip_gen: v7x
topology: tpu7x:2x2x1
jax: 0.10.0
libtpu: 0.0.40
codegen_flags: <defaults>
</compile_context>

<pallas_src>
import jax
import jax.numpy as jnp
from jax.experimental import pallas as pl
from jax.experimental.pallas import tpu as pltpu


def addition_kernel(idx_ref, lut_ref, out_ref):
    # idx_ref: [1, TILE_B] int32 packed pair index (a * vocab + b)
    # lut_ref: [n_out, n_pairs] f32 precomputed network outputs (transposed LUT)
    # out_ref: [n_out, TILE_B] f32
    idx = idx_ref[...]                                        # [1, TB]
    n_pairs = lut_ref.shape[1]
    tb = idx.shape[1]

    # One-hot on sublanes, batch on lanes -> fully lane-dense VPU compare.
    pair_iota = jax.lax.broadcasted_iota(jnp.int32, (n_pairs, tb), 0)
    oh = (pair_iota == idx).astype(jnp.float32)               # [n_pairs, TB]

    # Gather-as-matmul: each output column selects one LUT column.
    out_ref[...] = jnp.dot(lut_ref[...], oh,
                           preferred_element_type=jnp.float32)


def addition_model_forward(x, emb_table, w1, b1, w2, b2, *, tile_b=8192):
    """x: [B, 2] integer digits in [0, vocab). Weights [in, out], biases [1, out]."""
    B = x.shape[0]
    n_out = w2.shape[1]
    vocab = emb_table.shape[0]
    n_pairs = vocab * vocab

    # ---- Fold the whole constant MLP into a lookup table (inference-time consts).
    pair = jnp.arange(n_pairs, dtype=jnp.int32)
    a_all = pair // vocab
    b_all = pair % vocab
    emb32 = emb_table.astype(jnp.float32)
    combined = emb32[a_all] + emb32[b_all]                              # [n_pairs, d]
    h = jnp.maximum(combined @ w1.astype(jnp.float32)
                    + b1.astype(jnp.float32), 0.0)
    lut = h @ w2.astype(jnp.float32) + b2.astype(jnp.float32)           # [n_pairs, n_out]
    lut_t = lut.T                                                       # [n_out, n_pairs]

    # ---- Packed index row, batch on lanes.
    idx = (x[:, 0].astype(jnp.int32) * vocab
           + x[:, 1].astype(jnp.int32))[None, :]                        # [1, B]

    # ---- Lane-aligned batch tile.
    tile = min(tile_b, B)
    tile = ((tile + 127) // 128) * 128
    n_tiles = pl.cdiv(B, tile)
    # v7x megacore: if everything fit in one tile but the batch is big enough,
    # split it so the "parallel" grid axis can shard across both TensorCores.
    if n_tiles == 1 and B > 2 * 128:
        tile = ((pl.cdiv(B, 2) + 127) // 128) * 128
        n_tiles = pl.cdiv(B, tile)
    b_pad = n_tiles * tile
    if b_pad != B:
        # Pair index 0 is valid; padded columns are sliced off below.
        idx = jnp.pad(idx, ((0, 0), (0, b_pad - B)))

    out_t = pl.pallas_call(
        addition_kernel,
        out_shape=jax.ShapeDtypeStruct((n_out, b_pad), jnp.float32),
        grid=(n_tiles,),
        in_specs=[
            pl.BlockSpec((1, tile), lambda i: (0, i)),        # packed idx row
            pl.BlockSpec(lut_t.shape, lambda i: (0, 0)),      # LUT (VMEM-resident, ~4 KB)
        ],
        out_specs=pl.BlockSpec((n_out, tile), lambda i: (0, i)),
        compiler_params=pltpu.CompilerParams(
            dimension_semantics=("parallel",),
            vmem_limit_bytes=32 * 1024 * 1024,
        ),
        cost_estimate=pl.CostEstimate(
            flops=2 * n_out * n_pairs * b_pad,
            transcendentals=0,
            bytes_accessed=4 * (b_pad + n_out * n_pairs + n_out * b_pad),
        ),
    )(idx, lut_t)

    # Back to the module's [B, n_out] layout.
    return out_t[:, :B].T


def init_params(key, vocab=10, embedding_dim=8, hidden_dim=24, n_classes=10):
    k_emb, k_w1, k_b1, k_w2, k_b2 = jax.random.split(key, 5)
    # nn.Embedding: N(0, 1)
    emb_table = jax.random.normal(k_emb, (vocab, embedding_dim), jnp.float32)
    # nn.Linear: U(-1/sqrt(fan_in), 1/sqrt(fan_in)); stored transposed [in, out]
    bound1 = 1.0 / jnp.sqrt(embedding_dim)
    w1 = jax.random.uniform(k_w1, (embedding_dim, hidden_dim), jnp.float32,
                            -bound1, bound1)
    b1 = jax.random.uniform(k_b1, (1, hidden_dim), jnp.float32, -bound1, bound1)
    bound2 = 1.0 / jnp.sqrt(hidden_dim)
    w2 = jax.random.uniform(k_w2, (hidden_dim, n_classes), jnp.float32,
                            -bound2, bound2)
    b2 = jax.random.uniform(k_b2, (1, n_classes), jnp.float32, -bound2, bound2)
    return emb_table, w1, b1, w2, b2


def reference_forward(x, emb_table, w1, b1, w2, b2):
    a_emb = emb_table[x[:, 0]]
    b_emb = emb_table[x[:, 1]]
    combined = a_emb + b_emb
    h = jnp.maximum(combined @ w1 + b1, 0.0)
    return h @ w2 + b2


if __name__ == "__main__":
    key = jax.random.PRNGKey(0)
    k_params, k_x1, k_x2 = jax.random.split(key, 3)

    emb_table, w1, b1, w2, b2 = init_params(k_params)

    # Small-shape check (single 128-wide tile, padded tail).
    B = 8
    x = jax.random.randint(k_x1, (B, 2), 0, 10, dtype=jnp.int32)
    out = jax.block_until_ready(addition_model_forward(x, emb_table, w1, b1, w2, b2))
    ref = reference_forward(x, emb_table, w1, b1, w2, b2)
    assert out.shape == (B, 10)
    assert jnp.allclose(out, ref, atol=1e-5, rtol=1e-5)

    # Larger check exercising the multi-tile grid + padding path.
    B2 = 300
    x2 = jax.random.randint(k_x2, (B2, 2), 0, 10, dtype=jnp.int32)
    out2 = jax.block_until_ready(
        addition_model_forward(x2, emb_table, w1, b1, w2, b2, tile_b=128))
    ref2 = reference_forward(x2, emb_table, w1, b1, w2, b2)
    assert out2.shape == (B2, 10)
    assert jnp.allclose(out2, ref2, atol=1e-5, rtol=1e-5)

    print("KERNEL_OK")
</pallas_src>

<mosaic_0001>
module attributes {stable_mosaic.version = 11 : i64} {
  func.func @addition_kernel(%arg0: i32, %arg1: memref<1x128xi32, #tpu.memory_space<vmem>>, %arg2: memref<10x100xf32, #tpu.memory_space<vmem>>, %arg3: memref<10x128xf32, #tpu.memory_space<vmem>>) attributes {dimension_semantics = [#tpu.dimension_semantics<parallel>], iteration_bounds = array<i64: 1>, scalar_prefetch = 0 : i64, scratch_operands = 0 : i64, tpu.core_type = #tpu.core_type<tc>, window_params = [{transform_indices = @transform_0, window_bounds = array<i64: 1, 128>}, {pipeline_mode = #tpu.pipeline_mode<synchronous>, transform_indices = @transform_1, window_bounds = array<i64: 10, 100>}, {transform_indices = @transform_2, window_bounds = array<i64: 10, 128>}]} {
    %c0 = arith.constant 0 : index
    %c0_0 = arith.constant 0 : index
    %0 = vector.load %arg1[%c0, %c0_0] : memref<1x128xi32, #tpu.memory_space<vmem>>, vector<1x128xi32>
    %1 = tpu.iota {dimensions = array<i32: 0>} : vector<100x128xi32>
    %2 = vector.broadcast %0 : vector<1x128xi32> to vector<100x128xi32>
    %3 = arith.cmpi eq, %1, %2 : vector<100x128xi32>
    %4 = arith.extui %3 : vector<100x128xi1> to vector<100x128xi32>
    %5 = arith.sitofp %4 : vector<100x128xi32> to vector<100x128xf32>
    %c0_1 = arith.constant 0 : index
    %c0_2 = arith.constant 0 : index
    %6 = vector.load %arg2[%c0_1, %c0_2] : memref<10x100xf32, #tpu.memory_space<vmem>>, vector<10x100xf32>
    %cst = arith.constant dense<0.000000e+00> : vector<10x128xf32>
    %7 = tpu.matmul %6, %5, %cst {dimension_numbers = #tpu.dot_dimension_numbers<[1], [0], [0], [1], [0, 0, 1, 1], [], []>} : vector<10x100xf32>, vector<100x128xf32>, vector<10x128xf32> -> vector<10x128xf32>
    %c0_3 = arith.constant 0 : index
    %c0_4 = arith.constant 0 : index
    %8 = vector.load %arg3[%c0_3, %c0_4] : memref<10x128xf32, #tpu.memory_space<vmem>>, vector<10x128xf32>
    tpu.vector_store %arg3[%c0_3, %c0_4], %7 {strides = array<i32>} : memref<10x128xf32, #tpu.memory_space<vmem>>, vector<10x128xf32>,
    return
  }
  func.func @transform_0(%arg0: i32) -> (i32, i32) {
    %c0_i32 = arith.constant 0 : i32
    %c0_i32_0 = arith.constant 0 : i32
    return %c0_i32, %arg0 : i32, i32
  }
  func.func @transform_1(%arg0: i32) -> (i32, i32) {
    %c0_i32 = arith.constant 0 : i32
    %c0_i32_0 = arith.constant 0 : i32
    %c0_i32_1 = arith.constant 0 : i32
    return %c0_i32, %c0_i32_0 : i32, i32
  }
  func.func @transform_2(%arg0: i32) -> (i32, i32) {
    %c0_i32 = arith.constant 0 : i32
    %c0_i32_0 = arith.constant 0 : i32
    return %c0_i32, %arg0 : i32, i32
  }
}

</mosaic_0001>

<bundles_post_ra>
// kernel: tpu_custom_call.1
= control target key start
LH: loop header
LB: loop body
LE: loop exit
PB: predicated region body
PF: predicated region fallthrough
CT: control target
= control target key end

     0   :  { %7 = vsyncpa [#allocation3], 0  ;;  %s453_s0 = inlined_call_operand.hbm [shape: s32[1,128], index: 0, kind: input, shape index: {}]   ;;  %s454_s1 = inlined_call_operand.hbm [shape: f32[10,100], index: 1, kind: input, shape index: {}]   ;;  %s455_s2 = inlined_call_operand.hbm [shape: f32[10,128], index: 2, kind: output, shape index: {}]  }
   0x1   :  { %8 = vsyncpa [#allocation6], 0 }
   0x2   :  { %9 = vsyncpa [#allocation4], 0  ;;  %s380_s9 = smov [#allocation2]   ;;  %s381_s11 = smov [#allocation5]  }
   0x3   :  { %s16_s10 = sshll.u32 %s380_s9, 4  ;;  %s25_s12 = sshll.u32 %s381_s11, 4  ;;  %s17_s10 = int_to_ptr.vmem [resolvable:$true] %s16_s10  ;;  %s402_s12 = int_to_ptr.vmem [resolvable:$true] %s25_s12 }
   0x4   :  { %s308_s15 = scalar_lea.hbm %s453_s0, 16 }
   0x5   :  { %p309_p0 = scmp.ne.s32.totalorder %s453_s0, %s308_s15  ;;  %p312_p1 = scmp.lt.u32.totalorder %s308_s15, %s453_s0 }
   0x7   :  { %p314_p2 = pnand %p312_p1, %p309_p0 }
   0x9   :  { %317 = shalt.err (!%p314_p2)
}
   0xa   :  { %s318_s20 = scalar_lea.vmem %s17_s10, 16  ;;  %s322_s21 = scalar_lea.vmem %s17_s10, 32 }
   0xb   :  { %p319_p3 = scmp.ne.s32.totalorder %s17_s10, %s318_s20  ;;  %p323_p4 = scmp.lt.s32.totalorder %s17_s10, %s17_s10 }
   0xc   :  { %p324_p5 = scmp.lt.s32.totalorder %s322_s21, %s318_s20 }
   0xe   :  { %p325_p6 = por %p324_p5, %p323_p4 }
  0x10   :  { %p326_p7 = pnand %p325_p6, %p319_p3 }
  0x12   :  { %329 = shalt.err (!%p326_p7)
}
  0x13   :  { %19 = dma.hbm_to_vmem [thread:$0]  %s453_s0, 16, %s17_s10, [#allocation3]  }
  0x14   :  { %s330_s26 = scalar_lea.hbm %s454_s1, 256 }
  0x15   :  { %p331_p8 = scmp.ne.s32.totalorder %s454_s1, %s330_s26  ;;  %p334_p9 = scmp.lt.u32.totalorder %s330_s26, %s454_s1 }
  0x17   :  { %p336_p10 = pnand %p334_p9, %p331_p8 }
  0x19   :  { %339 = shalt.err (!%p336_p10)
}
  0x1a   :  { %s340_s3 = scalar_lea.vmem %s402_s12, 256  ;;  %p345_p12 = scmp.lt.s32.totalorder %s402_s12, %s402_s12 }
  0x1b   :  { %p341_p11 = scmp.ne.s32.totalorder %s402_s12, %s340_s3  ;;  %p346_p13 = scmp.lt.s32.totalorder %s340_s3, %s340_s3 }
  0x1d   :  { %p347_p0 = por %p346_p13, %p345_p12 }
  0x1f   :  { %p348_p1 = pnand %p347_p0, %p341_p11 }
  0x21   :  { %351 = shalt.err (!%p348_p1)
}
  0x22   :  { %s382_s0 = smov 128   ;;  %s383_s4 = smov 8  }
  0x23   :  { %31 = dma.hbm_to_vmem [thread:$0]  %s454_s1, 256, %s402_s12, [#allocation6], %s382_s0, %s382_s0, %s383_s4  }
  0x24   :  { %374 = dma.done.wait [#allocation3], 16  }
  0x25   :  { %375 = vsyncadd [#allocation3], 4294967280 }
  0x26   :  { %376 = dma.done.wait [#allocation6], 256  }
  0x27   :  { %377 = vsyncadd [#allocation6], 4294967040  ;;  %v39_v0 = vlaneseq  ;;  %vm98_vm0 = vcmask 818176   ;;  %v204_v7 = vld [vmem:[#allocation2] ss:$0 sm:$0xff]  ;;  %v96_v8 = vld [vmem:[#allocation5] sm:$0xff] }
  0x28   :  { %274 = vmatprep.mubr.msk.f32.mxu0 %vm98_vm0, %v96_v8  ;;  %v384_v9 = vmov 1.0|1.0   ;;  %v385_v17 = vmov 0.0   ;;  %v97_v19 = vld [vmem:[#allocation5 + $0x8] sm:$0x3]  ;;  %s386_s1 = smov [#allocation7]  }
  0x29   :  { %v40_v1 = vshrl.u32 %v39_v0, 7  ;;  %s191_s7 = sshll.u32 %s386_s1, 4  ;;  %s192_s7 = int_to_ptr.vmem [resolvable:$true] %s191_s7 }
  0x2a   :  { %s352_s8 = scalar_lea.vmem %s192_s7, 256  ;;  %p357_p3 = scmp.lt.s32.totalorder %s192_s7, %s192_s7 }
  0x2b   :  { %v41_v2 = vadd.s32 8, %v40_v1  ;;  %v42_v3 = vadd.s32 16, %v40_v1  ;;  %v43_v4 = vadd.s32 24, %v40_v1  ;;  %v44_v5 = vadd.s32 32, %v40_v1  ;;  %p353_p2 = scmp.ne.s32.totalorder %s192_s7, %s352_s8  ;;  %p358_p4 = scmp.lt.s32.totalorder %s352_s8, %s352_s8 }
  0x2c   :  { %v45_v6 = vadd.s32 40, %v40_v1  ;;  %vm57_vm1 = vcmp.eq.s32.totalorder %v40_v1, %v204_v7  ;;  %v46_v10 = vadd.s32 48, %v40_v1  ;;  %v47_v11 = vadd.s32 56, %v40_v1 }
  0x2d   :  { %vm58_vm2 = vcmp.eq.s32.totalorder %v41_v2, %v204_v7  ;;  %vm59_vm3 = vcmp.eq.s32.totalorder %v42_v3, %v204_v7  ;;  %vm60_vm4 = vcmp.eq.s32.totalorder %v43_v4, %v204_v7  ;;  %vm61_vm7 = vcmp.eq.s32.totalorder %v44_v5, %v204_v7  ;;  %p359_p5 = por %p358_p4, %p357_p3 }
  0x2e   :  { %vm277_vm5 = vmpackc.low %vm58_vm2, %vm57_vm1  ;;  %vm62_vm8 = vcmp.eq.s32.totalorder %v45_v6, %v204_v7  ;;  %vm63_vm10 = vcmp.eq.s32.totalorder %v46_v10, %v204_v7  ;;  %vm64_vm11 = vcmp.eq.s32.totalorder %v47_v11, %v204_v7  ;;  %v48_v12 = vadd.s32 64, %v40_v1 }
  0x2f   :  { %278 = vmatprep.subr.msk.bf16.mxu0 %vm277_vm5, %v384_v9  ;;  %vm281_vm6 = vmpackc.low %vm60_vm4, %vm59_vm3  ;;  %v49_v13 = vadd.s32 72, %v40_v1  ;;  %v50_v14 = vadd.s32 80, %v40_v1  ;;  %v51_v15 = vadd.s32 88, %v40_v1  ;;  %v52_v16 = vadd.s32 96, %v40_v1  ;;  %p360_p6 = pnand %p359_p5, %p353_p2 }
  0x30   :  { %280 = vmatpush3.bf16.msk.msra.mxu0 %vm277_vm5, %v384_v9  ;;  %vm285_vm9 = vmpackc.low %vm62_vm8, %vm61_vm7  ;;  %vm65_vm13 = vcmp.eq.s32.totalorder %v48_v12, %v204_v7  ;;  %vm105_vm5 = vcmask 1043456  }
  0x31   :  { %282 = vmatprep.subr.msk.bf16.mxu0 %vm281_vm6, %v384_v9  ;;  %vm289_vm12 = vmpackc.low %vm64_vm11, %vm63_vm10  ;;  %vm66_vm14 = vcmp.eq.s32.totalorder %v49_v13, %v204_v7  ;;  %vm67_vm1 = vcmp.eq.s32.totalorder %v50_v14, %v204_v7  ;;  %vm68_vm2 = vcmp.eq.s32.totalorder %v51_v15, %v204_v7  ;;  %vm69_vm4 = vcmp.eq.s32.totalorder %v52_v16, %v204_v7 }
  0x32   :  { %vm293_vm15 = vmpackc.low %vm66_vm14, %vm65_vm13  ;;  %v217_v18 = vsel %vm69_vm4, 1.0, %v385_v17 }
  0x33   :  { %vm297_vm3 = vmpackc.low %vm68_vm2, %vm67_vm1 }
  0x34   :  { %284 = vmatpush3.bf16.msk.msra.mxu0 %vm281_vm6, %v384_v9 }
  0x35   :  { %286 = vmatprep.subr.msk.bf16.mxu0 %vm285_vm9, %v384_v9 }
  0x38   :  { %288 = vmatpush3.bf16.msk.msra.mxu0 %vm285_vm9, %v384_v9 }
  0x39   :  { %290 = vmatprep.subr.msk.bf16.mxu0 %vm289_vm12, %v384_v9 }
  0x3c   :  { %292 = vmatpush3.bf16.msk.msra.mxu0 %vm289_vm12, %v384_v9 }
  0x3d   :  { %294 = vmatprep.subr.msk.bf16.mxu0 %vm293_vm15, %v384_v9 }
  0x40   :  { %296 = vmatpush3.bf16.msk.msra.mxu0 %vm293_vm15, %v384_v9 }
  0x41   :  { %298 = vmatprep.subr.msk.bf16.mxu0 %vm297_vm3, %v384_v9 }
  0x44   :  { %300 = vmatpush3.bf16.msk.msra.mxu0 %vm297_vm3, %v384_v9 }
  0x45   :  { %272 = vmatprep.subr.msk.mxu0 %vm105_vm5, %v217_v18 }
  0x48   :  { %273 = vmatpush3.msk.msra.mxu0 %vm105_vm5, %v217_v18 }
  0x49   :  { %275 = vmatmul.mubr.msk.f32.vlgmr.msra.gmra.mrb[0].mxu0 %vm98_vm0, %v97_v19 }
 0x11c   :  { %v276_v20 = vpop.f32.mrb[0].mxu0 }
 0x11d   :  { %185 = vst [vmem:[#allocation7 + $0x8] sm:$0x3] %v276_v20  ;;  %v175_v21 = vpop.f32.mrb[1].mxu0 }
 0x11e   :  { %184 = vst [vmem:[#allocation7] sm:$0xff] %v175_v21 }
 0x11f   :  { %363 = shalt.err (!%p360_p6)
}
 0x120   :  { %s364_s11 = scalar_lea.hbm %s455_s2, 256 }
 0x121   :  { %p365_p7 = scmp.ne.s32.totalorder %s455_s2, %s364_s11  ;;  %p368_p8 = scmp.lt.u32.totalorder %s364_s11, %s455_s2 }
 0x123   :  { %p370_p9 = pnand %p368_p8, %p365_p7 }
 0x125   :  { %373 = shalt.err (!%p370_p9)
}
 0x126   :  { %197 = dma.vmem_to_hbm [thread:$0]  %s192_s7, 256, %s455_s2, [#allocation4], %s382_s0, %s382_s0, %s383_s4  }
 0x127   :  { %378 = dma.done.wait [#allocation4], 256  }
 0x128   :  { %379 = vsyncadd [#allocation4], 4294967040 }
 0x129   :  { %201 = vsyncpa [#allocation3], 1 }
 0x12a   :  { %202 = vsyncpa [#allocation6], 1 }
 0x12b   :  { %203 = vsyncpa [#allocation4], 1 }

</bundles_post_ra>
